<compile_context>
chip_gen: v5e
topology: v5e:2x2
jax: 0.10.0
libtpu: 0.0.40
codegen_flags: <defaults>
</compile_context>

<pallas_src>
import math

import jax
import jax.numpy as jnp
from jax.experimental import pallas as pl
from jax.experimental.pallas import tpu as pltpu

# ---- module hyper-parameters (small synthetic sizes) ----
PROMPT_DIM = 16     # prompt_dim  (D)
PROMPT_LEN = 5      # prompt_len  (L)
PROMPT_SIZE = 8     # prompt_size (S)
LIN_DIM = 32        # lin_dim     (C)
B, H, W = 2, 16, 16


# ----------------------------------------------------------------------------
# glue helpers (plain JAX, run once per parameter set -- NOT per forward call)
# ----------------------------------------------------------------------------
def _bilinear_matrix(out_size, in_size):
    """Row-interpolation matrix matching F.interpolate(mode='bilinear',
    align_corners=False): out = R @ in."""
    scale = in_size / out_size
    src = (jnp.arange(out_size, dtype=jnp.float32) + 0.5) * scale - 0.5
    src = jnp.maximum(src, 0.0)                       # torch clamps negatives
    i0 = jnp.clip(jnp.floor(src).astype(jnp.int32), 0, in_size - 1)
    i1 = jnp.minimum(i0 + 1, in_size - 1)
    w1 = src - i0.astype(jnp.float32)
    w0 = 1.0 - w1
    oh0 = jax.nn.one_hot(i0, in_size, dtype=jnp.float32)
    oh1 = jax.nn.one_hot(i1, in_size, dtype=jnp.float32)
    return w0[:, None] * oh0 + w1[:, None] * oh1      # (out_size, in_size)


def make_params(key):
    """Deterministic synthetic parameters matching the torch module shapes."""
    k1, k2, k3, k4 = jax.random.split(key, 4)
    prompt_param = jax.random.uniform(
        k1, (1, PROMPT_LEN, PROMPT_DIM, PROMPT_SIZE, PROMPT_SIZE), jnp.float32)
    bl = 1.0 / math.sqrt(LIN_DIM)
    linear_w = jax.random.uniform(k2, (PROMPT_LEN, LIN_DIM), jnp.float32, -bl, bl)
    linear_b = jax.random.uniform(k3, (PROMPT_LEN,), jnp.float32, -bl, bl)
    bc = 1.0 / math.sqrt(PROMPT_DIM * 9)
    conv_w = jax.random.uniform(
        k4, (PROMPT_DIM, PROMPT_DIM, 3, 3), jnp.float32, -bc, bc)   # (Cout,Cin,3,3)
    return dict(prompt_param=prompt_param, linear_w=linear_w,
                linear_b=linear_b, conv_w=conv_w)


def prepare_params(params, Hx, Wx):
    """One-time fold of every linear-in-w stage into a single f32 matrix.

    Big[l, cout*H*W + hw] = [ conv3x3( bilinear_upsample( prompt_param[l] ) ) ]
    so the per-call kernel only needs  softmax(linear(mean(x)))  @  Big.
    """
    L, D, S = PROMPT_LEN, PROMPT_DIM, PROMPT_SIZE
    SS, HW = S * S, Hx * Wx

    # prompt params, channels-first & spatially flattened: ppT[l, cin, s*S+t]
    ppT = params["prompt_param"][0].reshape(L, D, SS).astype(jnp.float32)

    # linear layer:  logits = emb @ wl + bl
    wl = params["linear_w"].T.astype(jnp.float32)                  # (C, L)
    bl = params["linear_b"].reshape(1, L).astype(jnp.float32)      # (1, L)

    # conv taps as (Cout, Cin) matrices, k = ky*3 + kx
    wkT = jnp.transpose(params["conv_w"], (2, 3, 0, 1)).reshape(9, D, D)
    wkT = wkT.astype(jnp.float32)                                  # (9, D, D)

    # pad + 3x3 shift + bilinear upsample folded into 9 dense matrices
    # Rk[k, hw, ss]: prompt pixel ss -> padded/shifted/upsampled output pixel hw
    rh_pad = jnp.zeros((Hx + 2, S), jnp.float32).at[1:Hx + 1].set(_bilinear_matrix(Hx, S))
    rw_pad = jnp.zeros((Wx + 2, S), jnp.float32).at[1:Wx + 1].set(_bilinear_matrix(Wx, S))
    rk = jnp.stack([jnp.kron(rh_pad[ky:ky + Hx], rw_pad[kx:kx + Wx])
                    for ky in range(3) for kx in range(3)])        # (9, HW, SS)

    # per-tap channel mix of the prompt basis, then contract taps+prompt pixels
    ppc = jnp.einsum('koc,lcs->lkos', wkT, ppT)                    # (L, 9, D, SS)
    big = jnp.einsum('lkos,khs->loh', ppc, rk)                     # (L, D, HW)
    big = big.reshape(L, D * HW).astype(jnp.float32)               # lane-dense

    return dict(wl=wl, bl=bl, big=big, Hx=Hx, Wx=Wx)


# ----------------------------------------------------------------------------
# fused kernel: spatial mean -> linear -> softmax -> (B,L) @ Big
# ----------------------------------------------------------------------------
def _prompt_gen_kernel(x_ref, wl_ref, bl_ref, big_ref, o_ref):
    # x_ref  : (B, C, H*W)   f32
    # wl_ref : (C, L)        f32
    # bl_ref : (1, L)        f32
    # big_ref: (L, D*H*W)    f32   (prompt basis with upsample+conv pre-folded)
    # o_ref  : (B, D*H*W)    f32   (lane-dense; reshapes straight to NCHW)

    # --- prompt mixing weights: spatial mean -> linear -> softmax ---
    emb = jnp.mean(x_ref[...], axis=-1)                              # (B, C)
    logits = jnp.dot(emb, wl_ref[...],
                     preferred_element_type=jnp.float32) + bl_ref[...]
    m = jnp.max(logits, axis=-1, keepdims=True)
    e = jnp.exp(logits - m)
    w = e / jnp.sum(e, axis=-1, keepdims=True)                       # (B, L)

    # --- single lane-dense matmul against the pre-folded prompt basis ---
    o_ref[...] = jnp.dot(w, big_ref[...],
                         preferred_element_type=jnp.float32)         # (B, D*HW)


# ----------------------------------------------------------------------------
# wrapper
# ----------------------------------------------------------------------------
def prompt_gen_block(x, prep):
    Bx, C, Hx, Wx = x.shape
    L, D = PROMPT_LEN, PROMPT_DIM
    HW = Hx * Wx

    # prepare_params bakes (H, W) into Big -- fail clearly on a mismatch.
    assert (Hx, Wx) == (prep["Hx"], prep["Wx"]), (
        f"prepare_params was built for H,W={prep['Hx']},{prep['Wx']} "
        f"but got {Hx},{Wx}; rebuild prep for this resolution")
    assert prep["wl"].shape[0] == C, "lin_dim mismatch with input channels"

    x_flat = x.reshape(Bx, C, HW).astype(jnp.float32)

    cost = pl.CostEstimate(
        flops=2 * Bx * C * HW + 2 * Bx * C * L + 2 * Bx * L * D * HW,
        transcendentals=Bx * L,
        bytes_accessed=4 * (x_flat.size + prep["wl"].size + prep["bl"].size
                            + prep["big"].size + Bx * D * HW),
    )

    out_flat = pl.pallas_call(
        _prompt_gen_kernel,
        out_shape=jax.ShapeDtypeStruct((Bx, D * HW), jnp.float32),
        compiler_params=pltpu.CompilerParams(vmem_limit_bytes=4 * 1024 * 1024),
        cost_estimate=cost,
    )(x_flat, prep["wl"], prep["bl"], prep["big"])

    # Row b of out_flat is [cout, h, w] flattened -> plain reshape to NCHW.
    return out_flat.reshape(Bx, D, Hx, Wx)


# ----------------------------------------------------------------------------
# pure-JAX reference (same math, standard XLA ops) for a sanity check
# ----------------------------------------------------------------------------
def reference(x, params):
    S = PROMPT_SIZE
    emb = x.mean(axis=(2, 3))
    logits = emb @ params["linear_w"].T + params["linear_b"]
    wgt = jax.nn.softmax(logits, axis=1)
    p = jnp.einsum('bl,ldst->bdst', wgt, params["prompt_param"][0])
    rh = _bilinear_matrix(x.shape[2], S)
    rw = _bilinear_matrix(x.shape[3], S)
    p = jnp.einsum('hs,bdst->bdht', rh, p)
    p = jnp.einsum('wt,bdht->bdhw', rw, p)
    return jax.lax.conv_general_dilated(
        p, params["conv_w"], (1, 1), ((1, 1), (1, 1)),
        dimension_numbers=('NCHW', 'OIHW', 'NCHW'))


if __name__ == "__main__":
    key = jax.random.PRNGKey(0)
    pkey, xkey = jax.random.split(key)
    params = make_params(pkey)
    x = jax.random.normal(xkey, (B, LIN_DIM, H, W), dtype=jnp.float32)

    prep = prepare_params(params, H, W)          # once per parameter set
    out = prompt_gen_block(x, prep)
    out = jax.block_until_ready(out)
    assert out.shape == (B, PROMPT_DIM, H, W), out.shape

    ref = reference(x, params)
    max_err = float(jnp.max(jnp.abs(out - ref)))
    # All-f32 path (the bf16 rcat of the previous version is gone); only
    # differences are accumulation order of the pre-folded einsums vs XLA conv.
    if max_err > 1e-3:
        raise AssertionError(f"kernel/reference mismatch, max abs err = {max_err}")

    print("KERNEL_OK")
</pallas_src>

<mosaic_0001>
module attributes {stable_mosaic.version = 11 : i64} {
  func.func @_prompt_gen_kernel(%arg0: memref<2x32x256xf32, #tpu.memory_space<vmem>>, %arg1: memref<32x5xf32, #tpu.memory_space<vmem>>, %arg2: memref<1x5xf32, #tpu.memory_space<vmem>>, %arg3: memref<5x4096xf32, #tpu.memory_space<vmem>>, %arg4: memref<2x4096xf32, #tpu.memory_space<vmem>>) attributes {dimension_semantics = [], scalar_prefetch = 0 : i64, scratch_operands = 0 : i64, tpu.core_type = #tpu.core_type<tc>} {
    %c0 = arith.constant 0 : index
    %c0_0 = arith.constant 0 : index
    %c0_1 = arith.constant 0 : index
    %0 = vector.load %arg0[%c0, %c0_0, %c0_1] : memref<2x32x256xf32, #tpu.memory_space<vmem>>, vector<2x32x256xf32>
    %cst = arith.constant dense<0.000000e+00> : vector<2x32xf32>
    %1 = vector.multi_reduction <add>, %0, %cst [2] : vector<2x32x256xf32> to vector<2x32xf32>
    %cst_2 = arith.constant 2.560000e+02 : f32
    %2 = vector.broadcast %cst_2 : f32 to vector<2x32xf32>
    %3 = arith.divf %1, %2 : vector<2x32xf32>
    %c0_3 = arith.constant 0 : index
    %c0_4 = arith.constant 0 : index
    %4 = vector.load %arg1[%c0_3, %c0_4] : memref<32x5xf32, #tpu.memory_space<vmem>>, vector<32x5xf32>
    %cst_5 = arith.constant dense<0.000000e+00> : vector<2x5xf32>
    %5 = tpu.matmul %3, %4, %cst_5 {dimension_numbers = #tpu.dot_dimension_numbers<[1], [0], [0], [1], [0, 0, 1, 1], [], []>} : vector<2x32xf32>, vector<32x5xf32>, vector<2x5xf32> -> vector<2x5xf32>
    %c0_6 = arith.constant 0 : index
    %c0_7 = arith.constant 0 : index
    %6 = vector.load %arg2[%c0_6, %c0_7] : memref<1x5xf32, #tpu.memory_space<vmem>>, vector<1x5xf32>
    %7 = vector.broadcast %6 : vector<1x5xf32> to vector<2x5xf32>
    %8 = arith.addf %5, %7 : vector<2x5xf32>
    %cst_8 = arith.constant dense<0xFF800000> : vector<2xf32>
    %9 = vector.multi_reduction <maximumf>, %8, %cst_8 [1] : vector<2x5xf32> to vector<2xf32>
    %10 = vector.shape_cast %9 : vector<2xf32> to vector<2x1xf32>
    %11 = vector.broadcast %10 : vector<2x1xf32> to vector<2x5xf32>
    %12 = arith.subf %8, %11 : vector<2x5xf32>
    %13 = math.exp %12 : vector<2x5xf32>
    %cst_9 = arith.constant dense<0.000000e+00> : vector<2xf32>
    %14 = vector.multi_reduction <add>, %13, %cst_9 [1] : vector<2x5xf32> to vector<2xf32>
    %15 = vector.shape_cast %14 : vector<2xf32> to vector<2x1xf32>
    %16 = vector.broadcast %15 : vector<2x1xf32> to vector<2x5xf32>
    %17 = arith.divf %13, %16 : vector<2x5xf32>
    %c0_10 = arith.constant 0 : index
    %c0_11 = arith.constant 0 : index
    %18 = vector.load %arg3[%c0_10, %c0_11] : memref<5x4096xf32, #tpu.memory_space<vmem>>, vector<5x4096xf32>
    %cst_12 = arith.constant dense<0.000000e+00> : vector<2x4096xf32>
    %19 = tpu.matmul %17, %18, %cst_12 {dimension_numbers = #tpu.dot_dimension_numbers<[1], [0], [0], [1], [0, 0, 1, 1], [], []>} : vector<2x5xf32>, vector<5x4096xf32>, vector<2x4096xf32> -> vector<2x4096xf32>
    %c0_13 = arith.constant 0 : index
    %c0_14 = arith.constant 0 : index
    %20 = vector.load %arg4[%c0_13, %c0_14] : memref<2x4096xf32, #tpu.memory_space<vmem>>, vector<2x4096xf32>
    tpu.vector_store %arg4[%c0_13, %c0_14], %19 {strides = array<i32>} : memref<2x4096xf32, #tpu.memory_space<vmem>>, vector<2x4096xf32>,
    return
  }
}

</mosaic_0001>

<bundles_post_ra>
// kernel: tpu_custom_call.1
= control target key start
LH: loop header
LB: loop body
LE: loop exit
PB: predicated region body
PF: predicated region fallthrough
CT: control target
= control target key end

     0   :  { %9 = vsyncpa [#allocation3], 0  ;;  %s1414_s0 = inlined_call_operand.hbm [shape: f32[2,32,256], index: 0, kind: input, shape index: {}]   ;;  %s1415_s1 = inlined_call_operand.vmem [shape: f32[32,5], index: 1, kind: input, shape index: {}]   ;;  %s1416_s2 = inlined_call_operand.vmem [shape: f32[1,5], index: 2, kind: input, shape index: {}]   ;;  %s1417_s3 = inlined_call_operand.hbm [shape: f32[5,4096], index: 3, kind: input, shape index: {}]   ;;  %s1418_s4 = inlined_call_operand.hbm [shape: f32[2,4096], index: 4, kind: output, shape index: {}]  }
   0x1   :  { %10 = vsyncpa [#allocation6], 0 }
   0x2   :  { %11 = vsyncpa [#allocation4], 0  ;;  %s16_s17 = sshll.u32 %s1414_s0, 4  ;;  %s1237_s18 = smov [#allocation2]   ;;  %s17_s17 = int_to_ptr.hbm [resolvable:$true] %s16_s17 }
   0x3   :  { %s18_s19 = sshll.u32 %s1237_s18, 4  ;;  %s34_s22 = sshll.u32 %s1417_s3, 4  ;;  %s19_s19 = int_to_ptr.vmem [resolvable:$true] %s18_s19  ;;  %s35_s22 = int_to_ptr.hbm [resolvable:$true] %s34_s22 }
   0x4   :  { %s1238_s23 = smov 256   ;;  %s1239_s24 = smov 16  }
   0x5   :  { %24 = dma.hbm_to_vmem [thread:$0]  %s17_s17, 2048, %s19_s19, [#allocation3], %s1238_s23, %s1238_s23, %s1239_s24  }
   0x6   :  { %s1240_s25 = smov [#allocation5]  }
   0x7   :  { %s36_s26 = sshll.u32 %s1240_s25, 4  ;;  %s37_s26 = int_to_ptr.vmem [resolvable:$true] %s36_s26 }
   0x8   :  { %39 = dma.hbm_to_vmem [thread:$0]  %s35_s22, 4096, %s37_s26, [#allocation6]  }
   0x9   :  { %1231 = dma.done.wait [#allocation3], 2048  }
   0xa   :  { %1232 = vsyncadd [#allocation3], 4294965248 }
   0xb   :  { %1233 = dma.done.wait [#allocation6], 4096  }
   0xc   :  { %1234 = vsyncadd [#allocation6], 4294963200  ;;  %v56_v0 = vld [vmem:[#allocation2 + $0x40] sm:$0xff]  ;;  %v57_v1 = vld [vmem:[#allocation2 + $0x48] sm:$0xff]  ;;  %v1241_v25 = vmov 256.0   ;;  %v119_v36 = vlaneseq  ;;  %vm124_vm1 = vcmask 130112  }
   0xd   :  { %v48_v2 = vld [vmem:[#allocation2] sm:$0xff]  ;;  %v76_v3 = vadd.f32 %v57_v1, %v56_v0  ;;  %v49_v4 = vld [vmem:[#allocation2 + $0x8] sm:$0xff]  ;;  %v58_v9 = vld [vmem:[#allocation2 + $0x50] sm:$0xff]  ;;  %1153 = vrcp.f32 %v1241_v25  ;;  %vm128_vm2 = vcmask 195712   ;;  %vm132_vm3 = vcmask 261312   ;;  %s1070_s11 = sshll.u32 %s1418_s4, 4  ;;  %s1071_s11 = int_to_ptr.hbm [resolvable:$true] %s1070_s11 }
   0xe   :  { %v52_v5 = vld [vmem:[#allocation2 + $0x20] sm:$0xff]  ;;  %v53_v6 = vld [vmem:[#allocation2 + $0x28] sm:$0xff]  ;;  %v64_v7 = vadd.f32 %v49_v4, %v48_v2  ;;  %v59_v10 = vld [vmem:[#allocation2 + $0x58] sm:$0xff]  ;;  %v120_v38 = vand.u32 127, %v119_v36  ;;  %vm141_vm4 = vcmask 1041409   ;;  %vm143_vm5 = vcmask 261120  }
   0xf   :  { %v70_v8 = vadd.f32 %v53_v6, %v52_v5  ;;  %77 = vadd.xlane.f32.xlu1 %v76_v3  ;;  %v50_v11 = vld [vmem:[#allocation2 + $0x10] sm:$0xff]  ;;  %v51_v12 = vld [vmem:[#allocation2 + $0x18] sm:$0xff]  ;;  %v60_v13 = vld [vmem:[#allocation2 + $0x60] sm:$0xff]  ;;  %v79_v15 = vadd.f32 %v59_v10, %v58_v9  ;;  %vm166_vm6 = vcmask 33792   ;;  %vm227_vm7 = vcmask 1044480  }
  0x10   :  { %65 = vadd.xlane.f32.xlu0 %v64_v7  ;;  %v61_v14 = vld [vmem:[#allocation2 + $0x68] sm:$0xff]  ;;  %v67_v16 = vadd.f32 %v51_v12, %v50_v11  ;;  %v62_v18 = vld [vmem:[#allocation2 + $0x70] sm:$0xff]  ;;  %v63_v19 = vld [vmem:[#allocation2 + $0x78] sm:$0xff]  ;;  %v122_v41 = vadd.s32 4294967288, %v120_v38  ;;  %v126_v50 = vadd.s32 4294967280, %v120_v38  ;;  %v130_v54 = vadd.s32 4294967272, %v120_v38 }
  0x11   :  { %71 = vadd.xlane.f32.xlu2 %v70_v8  ;;  %v82_v17 = vadd.f32 %v61_v14, %v60_v13  ;;  %v54_v20 = vld [vmem:[#allocation2 + $0x30] sm:$0xff]  ;;  %v55_v21 = vld [vmem:[#allocation2 + $0x38] sm:$0xff]  ;;  %v85_v22 = vadd.f32 %v63_v19, %v62_v18  ;;  %v104_v27 = vld [vmem:[%s1415_s1 + $0x8] sm:$0xff]  ;;  %vm223_vm12 = vcmask 39936   ;;  %vm1020_vm13 = vcmask 1041408  }
  0x12   :  { %v73_v23 = vadd.f32 %v55_v21, %v54_v20  ;;  %v106_v24 = vld [vmem:[%s1415_s1 + $0x18] sm:$0xff]  ;;  %v105_v26 = vld [vmem:[%s1415_s1 + $0x10] sm:$0xff]  ;;  %v103_v28 = vld [vmem:[%s1415_s1] sm:$0xff]  ;;  %vm1022_vm14 = vcmask 1045508   ;;  %vm1024_vm15 = vcmask 1043456  }
  0x13   :  { %158 = vmatpush.msra.mxu0 %v106_v24  ;;  %v1154_v29 = vpop.eup %1153  ;;  %v1152_v7 = vld [vmem:[%s1416_s2] ss:$0 sm:$0xff]  ;;  %v193_v18 = vld [vmem:[#allocation5 + $0x10] sm:$0x1f]  ;;  %v194_v20 = vld [vmem:[#allocation5 + $0x18] sm:$0x1f] }
  0x14   :  { %v89_v30 = vmul.f32 256.0, %v1154_v29  ;;  %vm93_vm0 = vweird.f32 %v1154_v29  ;;  %v197_v19 = vld [vmem:[#allocation5 + $0x30] sm:$0x1f]  ;;  %1086 = vmatpush.msk.msra.mxu3 %vm227_vm7, %v193_v18  ;;  %v196_v21 = vld [vmem:[#allocation5 + $0x28] sm:$0x1f]  ;;  %s1242_s2 = smov [#allocation7]  }
  0x15   :  { %159 = vmatpush.msra.mxu0 %v105_v26  ;;  %v198_v36 = vld [vmem:[#allocation5 + $0x38] sm:$0x1f]  ;;  %s1068_s8 = sshll.u32 %s1242_s2, 4  ;;  %s1069_s8 = int_to_ptr.vmem [resolvable:$true] %s1068_s8 }
  0x16   :  { %v90_v31 = vsub.f32 1.0, %v89_v30  ;;  %1092 = vmatpush.msk.msrb.mxu3 %vm227_vm7, %v196_v21 }
  0x17   :  { %80 = vadd.xlane.f32.xlu1 %v79_v15  ;;  %160 = vmatpush.msra.mxu0 %v104_v27 }
  0x18   :  { %68 = vadd.xlane.f32.xlu0 %v67_v16  ;;  %v91_v32 = vmul.f32 %v1154_v29, %v90_v31  ;;  %v191_v16 = vld [vmem:[#allocation5] sm:$0x1f] }
  0x19   :  { %83 = vadd.xlane.f32.xlu2 %v82_v17  ;;  %161 = vmatpush.msra.mxu0 %v103_v28  ;;  %v192_v17 = vld [vmem:[#allocation5 + $0x8] sm:$0x1f] }
  0x1a   :  { %v92_v37 = vadd.f32 %v1154_v29, %v91_v32  ;;  %1082 = vmatpush.msk.msra.mxu1 %vm227_vm7, %v191_v16  ;;  %1084 = vmatpush.msk.msra.mxu2 %vm227_vm7, %v192_v17 }
  0x1b   :  { %1094 = vmatpush.msk.msrb.mxu0 %vm227_vm7, %v197_v19 }
  0x1c   :  { %v94_v39 = vsel %vm93_vm0, %v1154_v29, %v92_v37  ;;  %1088 = vmatpush.msk.msrb.mxu1 %vm227_vm7, %v194_v20  ;;  %v200_v37 = vld [vmem:[#allocation5 + $0x48] sm:$0x1f] }
  0x1f   :  { %86 = vadd.xlane.f32.xlu1 %v85_v22  ;;  %v195_v22 = vld [vmem:[#allocation5 + $0x20] sm:$0x1f] }
  0x20   :  { %74 = vadd.xlane.f32.xlu0 %v73_v23  ;;  %v201_v23 = vld [vmem:[#allocation5 + $0x50] sm:$0x1f]  ;;  %1090 = vmatpush.msk.msrb.mxu2 %vm227_vm7, %v195_v22 }
  0x82   :  { %v78_v33 = vpop.xlane.xlu1 %77 }
  0x83   :  { %v66_v34 = vpop.xlane.xlu0 %65  ;;  %v99_v46 = vmul.f32 %v94_v39, %v78_v33 }
  0x84   :  { %v72_v35 = vpop.xlane.xlu2 %71  ;;  %v95_v47 = vmul.f32 %v94_v39, %v66_v34 }
  0x85   :  { %v134_v52 = vperm.slane %v99_v46, %v120_v38  ;;  %v97_v53 = vmul.f32 %v94_v39, %v72_v35  ;;  %v207_v46 = vld [vmem:[#allocation5 + $0x80] sm:$0x1f] }
  0x86   :  { %v121_v55 = vperm.slane %v95_v47, %v120_v38  ;;  %v199_v38 = vld [vmem:[#allocation5 + $0x40] sm:$0x1f]  ;;  %v213_v47 = vld [vmem:[#allocation5 + $0xb0] sm:$0x1f] }
  0x87   :  { %v127_v63 = vperm.slane %v97_v53, %v126_v50  ;;  %v216_v53 = vld [vmem:[#allocation5 + $0xc8] sm:$0x1f] }
  0x8a   :  { %v81_v40 = vpop.xlane.xlu1 %80 }
  0x8b   :  { %v100_v42 = vmul.f32 %v94_v39, %v81_v40  ;;  %v69_v43 = vpop.xlane.xlu0 %68  ;;  %v202_v40 = vld [vmem:[#allocation5 + $0x58] sm:$0x1f] }
  0x8c   :  { %v84_v44 = vpop.xlane.xlu2 %83  ;;  %v96_v45 = vmul.f32 %v94_v39, %v69_v43  ;;  %v209_v43 = vld [vmem:[#allocation5 + $0x90] sm:$0x1f] }
  0x8d   :  { %v101_v48 = vmul.f32 %v94_v39, %v84_v44  ;;  %v135_v49 = vperm.slane %v100_v42, %v122_v41  ;;  %v203_v42 = vld [vmem:[#allocation5 + $0x60] sm:$0x1f]  ;;  %v206_v44 = vld [vmem:[#allocation5 + $0x78] sm:$0x1f] }
  0x8e   :  { %v123_v51 = vperm.slane %v96_v45, %v122_v41  ;;  %v204_v41 = vld [vmem:[#allocation5 + $0x68] sm:$0x1f] }
  0x8f   :  { %v137_v56 = vperm.slane %v101_v48, %v126_v50  ;;  %v136_v58 = vsel %vm124_vm1, %v135_v49, %v134_v52  ;;  %v208_v45 = vld [vmem:[#allocation5 + $0x88] sm:$0x1f]  ;;  %v210_v48 = vld [vmem:[#allocation5 + $0x98] sm:$0x1f]  ;;  %v211_v50 = vld [vmem:[#allocation5 + $0xa0] sm:$0x1f] }
  0x90   :  { %v125_v61 = vsel %vm124_vm1, %v123_v51, %v121_v55  ;;  %v212_v49 = vld [vmem:[#allocation5 + $0xa8] sm:$0x1f]  ;;  %v217_v51 = vld [vmem:[#allocation5 + $0xd0] sm:$0x1f]  ;;  %v214_v52 = vld [vmem:[#allocation5 + $0xb8] sm:$0x1f] }
  0x91   :  { %v138_v2 = vsel %vm128_vm2, %v137_v56, %v136_v58  ;;  %v129_v3 = vsel %vm128_vm2, %v127_v63, %v125_v61  ;;  %v221_v55 = vld [vmem:[#allocation5 + $0xf0] sm:$0x1f]  ;;  %v218_v56 = vld [vmem:[#allocation5 + $0xd8] sm:$0x1f]  ;;  %v219_v58 = vld [vmem:[#allocation5 + $0xe0] sm:$0x1f] }
  0x92   :  { %v87_v57 = vpop.xlane.xlu1 %86 }
  0x93   :  { %v102_v59 = vmul.f32 %v94_v39, %v87_v57  ;;  %v75_v60 = vpop.xlane.xlu0 %74  ;;  %v220_v57 = vld [vmem:[#allocation5 + $0xe8] sm:$0x1f] }
  0x94   :  { %v98_v62 = vmul.f32 %v94_v39, %v75_v60  ;;  %v205_v39 = vld [vmem:[#allocation5 + $0x70] sm:$0x1f] }
  0x95   :  { %v139_v0 = vperm.slane %v102_v59, %v130_v54  ;;  %v222_v59 = vld [vmem:[#allocation5 + $0xf8] sm:$0x1f] }
  0x96   :  { %v131_v1 = vperm.slane %v98_v62, %v130_v54  ;;  %v215_v54 = vld [vmem:[#allocation5 + $0xc0] sm:$0x1f] }
  0x97   :  { %v140_v4 = vsel %vm132_vm3, %v139_v0, %v138_v2 }
  0x98   :  { %v133_v5 = vsel %vm132_vm3, %v131_v1, %v129_v3 }
  0x99   :  { %v142_v6 = vsel %vm141_vm4, %v140_v4, %v133_v5 }
  0x9a   :  { %1081 = vmatmul.msk.f32.vlgmr.msra.gmra.mxu0 %vm143_vm5, %v142_v6 }
  0x9b   :  { %1102 = vmatpush.msk.msra.mxu0 %vm227_vm7, %v201_v23 }
 0x117   :  { %v163_v8 = vpop.f32.mrf.mxu0 }
 0x118   :  { %v164_v9 = vadd.f32 %v1152_v7, %v163_v8 }
 0x11a   :  { %v167_v10 = vsel %vm166_vm6, %v164_v9, -inf }
 0x11b   :  { %168 = vmax.xlane.f32.xlu2 %v167_v10 }
 0x18e   :  { %v169_v11 = vpop.xlane.xlu2 %168 }
 0x18f   :  { %v170_v12 = vsub.f32 %v164_v9, %v169_v11 }
 0x191   :  { %v171_v13 = vmul.f32 1.442695, %v170_v12 }
 0x193   :  { %1155 = vpow2.f32 %v171_v13 }
 0x199   :  { %v1156_v14 = vpop.eup %1155 }
 0x19a   :  { %v173_v15 = vsel %vm166_vm6, %v1156_v14, 0.0 }
 0x19b   :  { %174 = vadd.xlane.f32.xlu0 %v173_v15 }
 0x20e   :  { %v175_v24 = vpop.xlane.xlu0 %174 }
 0x20f   :  { %1157 = vrcp.f32 %v175_v24  ;;  %v187_v28 = vand.u32 2147483648, %v175_v24  ;;  %v185_v30 = vand.u32 2147483647, %v175_v24  ;;  %vm181_vm9 = vweird.f32 %v175_v24 }
 0x211   :  { %v188_v32 = vor.u32 1.1754944e-38, %v187_v28  ;;  %vm186_vm11 = vcmp.eq.f32.partialorder %v185_v30, 8.507059e+37 }
 0x215   :  { %v1158_v25 = vpop.eup %1157 }
 0x216   :  { %v177_v26 = vmul.f32 %v1158_v25, %v175_v24  ;;  %vm182_vm8 = vweird.f32 %v1158_v25 }
 0x217   :  { %vm183_vm10 = vmor %vm181_vm9, %vm182_vm8 }
 0x218   :  { %v178_v27 = vsub.f32 1.0, %v177_v26 }
 0x21a   :  { %v179_v29 = vmul.f32 %v1158_v25, %v178_v27 }
 0x21c   :  { %v180_v31 = vadd.f32 %v1158_v25, %v179_v29 }
 0x21e   :  { %v184_v33 = vsel %vm183_vm10, %v1158_v25, %v180_v31 }
 0x21f   :  { %v189_v34 = vsel %vm186_vm11, %v188_v32, %v184_v33 }
 0x220   :  { %v1297_v35 = vmul.f32 %v1156_v14, %v189_v34 }
 0x222   :  { %1083 = vmatmul.msk.f32.vlgmr.msra.gmra.mxu1 %vm223_vm12, %v1297_v35  ;;  %1085 = vmatmul.msk.f32.vlgmr.msra.gmra.mxu2 %vm223_vm12, %v1297_v35 }
 0x223   :  { %1087 = vmatmul.msk.f32.vlgmr.msra.gmra.mxu3 %vm223_vm12, %v1297_v35  ;;  %1095 = vmatmul.msk.f32.vlgmr.msrb.gmra.mxu0 %vm223_vm12, %v1297_v35 }
 0x224   :  { %1096 = vmatpush.msk.msra.mxu1 %vm227_vm7, %v198_v36  ;;  %1100 = vmatpush.msk.msra.mxu3 %vm227_vm7, %v200_v37 }
 0x225   :  { %1098 = vmatpush.msk.msra.mxu2 %vm227_vm7, %v199_v38  ;;  %1110 = vmatpush.msk.msrb.mxu0 %vm227_vm7, %v205_v39 }
 0x22a   :  { %1089 = vmatmul.msk.f32.vlgmr.msrb.gmra.mxu1 %vm223_vm12, %v1297_v35  ;;  %1091 = vmatmul.msk.f32.vlgmr.msrb.gmra.mxu2 %vm223_vm12, %v1297_v35 }
 0x22b   :  { %1093 = vmatmul.msk.f32.vlgmr.msrb.gmra.mxu3 %vm223_vm12, %v1297_v35  ;;  %1103 = vmatmul.msk.f32.vlgmr.msra.gmra.mxu0 %vm223_vm12, %v1297_v35 }
 0x22c   :  { %1104 = vmatpush.msk.msrb.mxu1 %vm227_vm7, %v202_v40  ;;  %1108 = vmatpush.msk.msrb.mxu3 %vm227_vm7, %v204_v41 }
 0x22d   :  { %1106 = vmatpush.msk.msrb.mxu2 %vm227_vm7, %v203_v42  ;;  %1118 = vmatpush.msk.msra.mxu0 %vm227_vm7, %v209_v43 }
 0x232   :  { %1097 = vmatmul.msk.f32.vlgmr.msra.gmra.mxu1 %vm223_vm12, %v1297_v35  ;;  %1099 = vmatmul.msk.f32.vlgmr.msra.gmra.mxu2 %vm223_vm12, %v1297_v35 }
 0x233   :  { %1101 = vmatmul.msk.f32.vlgmr.msra.gmra.mxu3 %vm223_vm12, %v1297_v35  ;;  %1111 = vmatmul.msk.f32.vlgmr.msrb.gmra.mxu0 %vm223_vm12, %v1297_v35 }
 0x234   :  { %1112 = vmatpush.msk.msra.mxu1 %vm227_vm7, %v206_v44  ;;  %1116 = vmatpush.msk.msra.mxu3 %vm227_vm7, %v208_v45 }
 0x235   :  { %1114 = vmatpush.msk.msra.mxu2 %vm227_vm7, %v207_v46  ;;  %1126 = vmatpush.msk.msrb.mxu0 %vm227_vm7, %v213_v47 }
 0x23a   :  { %1105 = vmatmul.msk.f32.vlgmr.msrb.gmra.mxu1 %vm223_vm12, %v1297_v35  ;;  %1107 = vmatmul.msk.f32.vlgmr.msrb.gmra.mxu2 %vm223_vm12, %v1297_v35 }
 0x23b   :  { %1109 = vmatmul.msk.f32.vlgmr.msrb.gmra.mxu3 %vm223_vm12, %v1297_v35  ;;  %1119 = vmatmul.msk.f32.vlgmr.msra.gmra.mxu0 %vm223_vm12, %v1297_v35 }
 0x23c   :  { %1120 = vmatpush.msk.msrb.mxu1 %vm227_vm7, %v210_v48  ;;  %1124 = vmatpush.msk.msrb.mxu3 %vm227_vm7, %v212_v49 }
 0x23d   :  { %1122 = vmatpush.msk.msrb.mxu2 %vm227_vm7, %v211_v50  ;;  %1134 = vmatpush.msk.msra.mxu0 %vm227_vm7, %v217_v51 }
 0x242   :  { %1113 = vmatmul.msk.f32.vlgmr.msra.gmra.mxu1 %vm223_vm12, %v1297_v35  ;;  %1115 = vmatmul.msk.f32.vlgmr.msra.gmra.mxu2 %vm223_vm12, %v1297_v35 }
 0x243   :  { %1117 = vmatmul.msk.f32.vlgmr.msra.gmra.mxu3 %vm223_vm12, %v1297_v35  ;;  %1127 = vmatmul.msk.f32.vlgmr.msrb.gmra.mxu0 %vm223_vm12, %v1297_v35 }
 0x244   :  { %1128 = vmatpush.msk.msra.mxu1 %vm227_vm7, %v214_v52  ;;  %1132 = vmatpush.msk.msra.mxu3 %vm227_vm7, %v216_v53 }
 0x245   :  { %1130 = vmatpush.msk.msra.mxu2 %vm227_vm7, %v215_v54  ;;  %1142 = vmatpush.msk.msrb.mxu0 %vm227_vm7, %v221_v55 }
 0x24a   :  { %1121 = vmatmul.msk.f32.vlgmr.msrb.gmra.mxu1 %vm223_vm12, %v1297_v35  ;;  %1123 = vmatmul.msk.f32.vlgmr.msrb.gmra.mxu2 %vm223_vm12, %v1297_v35 }
 0x24b   :  { %1125 = vmatmul.msk.f32.vlgmr.msrb.gmra.mxu3 %vm223_vm12, %v1297_v35  ;;  %1135 = vmatmul.msk.f32.vlgmr.msra.gmra.mxu0 %vm223_vm12, %v1297_v35 }
 0x24c   :  { %1136 = vmatpush.msk.msrb.mxu1 %vm227_vm7, %v218_v56  ;;  %1140 = vmatpush.msk.msrb.mxu3 %vm227_vm7, %v220_v57 }
 0x24d   :  { %1138 = vmatpush.msk.msrb.mxu2 %vm227_vm7, %v219_v58 }
 0x252   :  { %1129 = vmatmul.msk.f32.vlgmr.msra.gmra.mxu1 %vm223_vm12, %v1297_v35  ;;  %1131 = vmatmul.msk.f32.vlgmr.msra.gmra.mxu2 %vm223_vm12, %v1297_v35 }
 0x253   :  { %1133 = vmatmul.msk.f32.vlgmr.msra.gmra.mxu3 %vm223_vm12, %v1297_v35  ;;  %1143 = vmatmul.msk.f32.vlgmr.msrb.gmra.mxu0 %vm223_vm12, %v1297_v35 }
 0x254   :  { %1144 = vmatpush.msk.msra.mxu1 %vm227_vm7, %v222_v59 }
 0x25a   :  { %1137 = vmatmul.msk.f32.vlgmr.msrb.gmra.mxu1 %vm223_vm12, %v1297_v35  ;;  %1139 = vmatmul.msk.f32.vlgmr.msrb.gmra.mxu2 %vm223_vm12, %v1297_v35 }
 0x25b   :  { %1141 = vmatmul.msk.f32.vlgmr.msrb.gmra.mxu3 %vm223_vm12, %v1297_v35 }
 0x262   :  { %1145 = vmatmul.msk.f32.vlgmr.msra.gmra.mxu1 %vm223_vm12, %v1297_v35 }
 0x29f   :  { %v341_v60 = vpop.f32.mrf.mxu1 }
 0x2a0   :  { %v461_v61 = vpop.f32.mrf.mxu0 }
 0x2a1   :  { %v1000_v12 = vrot.slane %v461_v61, 4 }
 0x2a5   :  { %v361_v62 = vpop.f32.mrf.mxu2 }
 0x2a6   :  { %v996_v63 = vrot.slane %v361_v62, 6  ;;  %v381_v0 = vpop.f32.mrf.mxu3 }
 0x2a7   :  { %v401_v1 = vpop.f32.mrf.mxu1  ;;  %v997_v2 = vrot.slane %v381_v0, 4 }
 0x2a8   :  { %v998_v3 = vrot.slane %v401_v1, 2  ;;  %v1021_v4 = vsel %vm1020_vm13, %v341_v60, %v996_v63  ;;  %v541_v7 = vpop.f32.mrf.mxu0 }
 0x2a9   :  { %v1003_v22 = vrot.slane %v541_v7, 4 }
 0x2aa   :  { %v1023_v5 = vsel %vm1022_vm14, %v997_v2, %v998_v3 }
 0x2ab   :  { %v1025_v6 = vsel %vm1024_vm15, %v1021_v4, %v1023_v5 }
 0x2ac   :  { %1055 = vst [vmem:[#allocation7] sm:$0xff] %v1025_v6 }
 0x2ad   :  { %v421_v8 = vpop.f32.mrf.mxu2 }
 0x2ae   :  { %v441_v9 = vpop.f32.mrf.mxu3 }
 0x2af   :  { %v999_v10 = vrot.slane %v441_v9, 6  ;;  %v481_v11 = vpop.f32.mrf.mxu1 }
 0x2b0   :  { %v1001_v13 = vrot.slane %v481_v11, 2  ;;  %v621_v17 = vpop.f32.mrf.mxu0 }
 0x2b1   :  { %v1026_v14 = vsel %vm1020_vm13, %v421_v8, %v999_v10  ;;  %v1006_v32 = vrot.slane %v621_v17, 4 }
 0x2b2   :  { %v1027_v15 = vsel %vm1022_vm14, %v1000_v12, %v1001_v13 }
 0x2b3   :  { %v1028_v16 = vsel %vm1024_vm15, %v1026_v14, %v1027_v15 }
 0x2b4   :  { %1056 = vst [vmem:[#allocation7 + $0x8] sm:$0xff] %v1028_v16 }
 0x2b5   :  { %v501_v18 = vpop.f32.mrf.mxu2 }
 0x2b6   :  { %v521_v19 = vpop.f32.mrf.mxu3 }
 0x2b7   :  { %v1002_v20 = vrot.slane %v521_v19, 6  ;;  %v561_v21 = vpop.f32.mrf.mxu1 }
 0x2b8   :  { %v1004_v23 = vrot.slane %v561_v21, 2  ;;  %v701_v29 = vpop.f32.mrf.mxu0 }
 0x2b9   :  { %v1029_v24 = vsel %vm1020_vm13, %v501_v18, %v1002_v20  ;;  %v1009_v41 = vrot.slane %v701_v29, 4 }
 0x2ba   :  { %v1030_v25 = vsel %vm1022_vm14, %v1003_v22, %v1004_v23 }
 0x2bb   :  { %v1031_v26 = vsel %vm1024_vm15, %v1029_v24, %v1030_v25 }
 0x2bc   :  { %1057 = vst [vmem:[#allocation7 + $0x10] sm:$0xff] %v1031_v26 }
 0x2bd   :  { %v581_v27 = vpop.f32.mrf.mxu2 }
 0x2be   :  { %v601_v28 = vpop.f32.mrf.mxu3 }
 0x2bf   :  { %v1005_v30 = vrot.slane %v601_v28, 6  ;;  %v641_v31 = vpop.f32.mrf.mxu1 }
 0x2c0   :  { %v1007_v33 = vrot.slane %v641_v31, 2  ;;  %v781_v43 = vpop.f32.mrf.mxu0 }
 0x2c1   :  { %v1032_v34 = vsel %vm1020_vm13, %v581_v27, %v1005_v30  ;;  %v1012_v51 = vrot.slane %v781_v43, 4 }
 0x2c2   :  { %v1033_v35 = vsel %vm1022_vm14, %v1006_v32, %v1007_v33 }
 0x2c3   :  { %v1034_v36 = vsel %vm1024_vm15, %v1032_v34, %v1033_v35 }
 0x2c4   :  { %1058 = vst [vmem:[#allocation7 + $0x18] sm:$0xff] %v1034_v36 }
 0x2c5   :  { %v661_v37 = vpop.f32.mrf.mxu2 }
 0x2c6   :  { %v681_v38 = vpop.f32.mrf.mxu3 }
 0x2c7   :  { %v1008_v39 = vrot.slane %v681_v38, 6  ;;  %v721_v40 = vpop.f32.mrf.mxu1 }
 0x2c8   :  { %v1010_v42 = vrot.slane %v721_v40, 2  ;;  %v861_v55 = vpop.f32.mrf.mxu0 }
 0x2c9   :  { %v1035_v44 = vsel %vm1020_vm13, %v661_v37, %v1008_v39  ;;  %v1015_v61 = vrot.slane %v861_v55, 4 }
 0x2ca   :  { %v1036_v45 = vsel %vm1022_vm14, %v1009_v41, %v1010_v42 }
 0x2cb   :  { %v1037_v46 = vsel %vm1024_vm15, %v1035_v44, %v1036_v45 }
 0x2cc   :  { %1059 = vst [vmem:[#allocation7 + $0x20] sm:$0xff] %v1037_v46 }
 0x2cd   :  { %v741_v47 = vpop.f32.mrf.mxu2 }
 0x2ce   :  { %v761_v48 = vpop.f32.mrf.mxu3 }
 0x2cf   :  { %v1011_v49 = vrot.slane %v761_v48, 6  ;;  %v801_v50 = vpop.f32.mrf.mxu1 }
 0x2d0   :  { %v1013_v52 = vrot.slane %v801_v50, 2  ;;  %v941_v2 = vpop.f32.mrf.mxu0 }
 0x2d1   :  { %v1038_v53 = vsel %vm1020_vm13, %v741_v47, %v1011_v49  ;;  %v1018_v6 = vrot.slane %v941_v2, 4 }
 0x2d2   :  { %v1039_v54 = vsel %vm1022_vm14, %v1012_v51, %v1013_v52 }
 0x2d3   :  { %v1040_v56 = vsel %vm1024_vm15, %v1038_v53, %v1039_v54 }
 0x2d4   :  { %1060 = vst [vmem:[#allocation7 + $0x28] sm:$0xff] %v1040_v56 }
 0x2d5   :  { %v821_v58 = vpop.f32.mrf.mxu2 }
 0x2d6   :  { %v841_v57 = vpop.f32.mrf.mxu3 }
 0x2d7   :  { %v1014_v59 = vrot.slane %v841_v57, 6  ;;  %v881_v60 = vpop.f32.mrf.mxu1 }
 0x2d8   :  { %v1016_v62 = vrot.slane %v881_v60, 2 }
 0x2d9   :  { %v1041_v63 = vsel %vm1020_vm13, %v821_v58, %v1014_v59 }
 0x2da   :  { %v1042_v0 = vsel %vm1022_vm14, %v1015_v61, %v1016_v62 }
 0x2db   :  { %v1043_v1 = vsel %vm1024_vm15, %v1041_v63, %v1042_v0 }
 0x2dc   :  { %1061 = vst [vmem:[#allocation7 + $0x30] sm:$0xff] %v1043_v1 }
 0x2dd   :  { %v901_v8 = vpop.f32.mrf.mxu2 }
 0x2de   :  { %v921_v3 = vpop.f32.mrf.mxu3 }
 0x2df   :  { %v1017_v4 = vrot.slane %v921_v3, 6  ;;  %v961_v5 = vpop.f32.mrf.mxu1 }
 0x2e0   :  { %v1019_v7 = vrot.slane %v961_v5, 2 }
 0x2e1   :  { %v1044_v9 = vsel %vm1020_vm13, %v901_v8, %v1017_v4 }
 0x2e2   :  { %v1045_v10 = vsel %vm1022_vm14, %v1018_v6, %v1019_v7 }
 0x2e3   :  { %v1046_v11 = vsel %vm1024_vm15, %v1044_v9, %v1045_v10 }
 0x2e4   :  { %1062 = vst [vmem:[#allocation7 + $0x38] sm:$0xff] %v1046_v11 }
 0x2e5   :  { %1073 = dma.vmem_to_hbm [thread:$0]  %s1069_s8, 1024, %s1071_s11, [#allocation4]  }
 0x2e6   :  { %1235 = dma.done.wait [#allocation4], 1024  }
 0x2e7   :  { %1236 = vsyncadd [#allocation4], 4294966272 }
 0x2e8   :  { %1078 = vsyncpa [#allocation3], 1 }
 0x2e9   :  { %1079 = vsyncpa [#allocation6], 1 }
 0x2ea   :  { %1080 = vsyncpa [#allocation4], 1 }

</bundles_post_ra>
